<compile_context>
chip_gen: v7x
topology: tpu7x:2x2x1
jax: 0.10.0
libtpu: 0.0.40
codegen_flags: <defaults>
</compile_context>

<pallas_src>
import functools

import jax
import jax.numpy as jnp
from jax import lax
from jax.experimental import pallas as pl
from jax.experimental.pallas import tpu as pltpu


# --------------------------------------------------------------------------
# Generation-aware limits (v5e/v6e: 128 MiB physical VMEM; v7x: 64 MiB)
# --------------------------------------------------------------------------
def _detect_vmem_bytes():
    try:
        info = pltpu.get_tpu_info()
        for attr in ("vmem_capacity_bytes", "vmem_bytes", "vmem_size_bytes"):
            v = getattr(info, attr, None)
            if isinstance(v, int) and v > 0:
                return v
    except Exception:
        pass
    return 64 * 1024 * 1024  # conservative (v7x-like) default


_PHYS_VMEM = _detect_vmem_bytes()
if _PHYS_VMEM >= 100 * 1024 * 1024:           # v5e / v6e
    _VMEM_LIMIT = 96 * 1024 * 1024
    _TM_CANDIDATES = (1024, 512, 256, 128, 64, 32, 16, 8)
else:                                          # v7x (or unknown)
    _VMEM_LIMIT = 48 * 1024 * 1024
    _TM_CANDIDATES = (512, 256, 128, 64, 32, 16, 8)


def _round_up(x, m):
    return ((x + m - 1) // m) * m


def _pick_tile(dim, candidates=(512, 256, 128)):
    """Largest lane/sublane-friendly tile that divides `dim`, else the full dim."""
    for c in candidates:
        if dim % c == 0:
            return c
    return dim


def _pick_row_tile(H):
    """Row tile for spatial kernels: >=2 grid steps when possible, multiple of 8."""
    for hb in (32, 16, 8):
        if H % hb == 0 and H // hb >= 2:
            return hb
    return H


# --------------------------------------------------------------------------
# Kernel 1: tiled matmul + bias (+ optional fused residual add)
# --------------------------------------------------------------------------
def _matmul_bias_kernel(x_ref, w_ref, b_ref, o_ref, acc_ref):
    @pl.when(pl.program_id(2) == 0)
    def _():
        acc_ref[...] = jnp.zeros_like(acc_ref)

    acc_ref[...] += jnp.dot(x_ref[...], w_ref[...], preferred_element_type=jnp.float32)

    @pl.when(pl.program_id(2) == pl.num_programs(2) - 1)
    def _():
        o_ref[...] = (acc_ref[...] + b_ref[...].astype(jnp.float32)).astype(o_ref.dtype)


def _matmul_bias_res_kernel(x_ref, w_ref, b_ref, r_ref, o_ref, acc_ref):
    @pl.when(pl.program_id(2) == 0)
    def _():
        acc_ref[...] = jnp.zeros_like(acc_ref)

    acc_ref[...] += jnp.dot(x_ref[...], w_ref[...], preferred_element_type=jnp.float32)

    @pl.when(pl.program_id(2) == pl.num_programs(2) - 1)
    def _():
        o_ref[...] = (acc_ref[...] + b_ref[...].astype(jnp.float32)
                      + r_ref[...].astype(jnp.float32)).astype(o_ref.dtype)


def matmul_bias(x, w, b, residual=None):
    """x: [M, K], w: [K, N], b: [N] -> [M, N] (+ residual). f32 accumulation."""
    M, K = x.shape
    N = w.shape[1]

    M_pad = _round_up(M, 8)
    TM = next(t for t in _TM_CANDIDATES if M_pad % t == 0)
    if M_pad != M:  # only for tiny M (e.g. the [batch, embed] time projection)
        x = jnp.pad(x, ((0, M_pad - M), (0, 0)))
        if residual is not None:
            residual = jnp.pad(residual, ((0, M_pad - M), (0, 0)))
    TK = _pick_tile(K)
    TN = _pick_tile(N)
    # TODO(synk): for models whose channel count < 128, pad N to a multiple of
    # 128 at the wrapper so output stores stay lane-dense (vst, not vst.msk).

    in_specs = [
        pl.BlockSpec((TM, TK), lambda i, j, k: (i, k)),
        pl.BlockSpec((TK, TN), lambda i, j, k: (k, j)),
        pl.BlockSpec((1, TN), lambda i, j, k: (0, j)),
    ]
    args = [x, w, b.reshape(1, N)]
    if residual is not None:
        in_specs.append(pl.BlockSpec((TM, TN), lambda i, j, k: (i, j)))
        args.append(residual)
        kern = _matmul_bias_res_kernel
    else:
        kern = _matmul_bias_kernel

    out = pl.pallas_call(
        kern,
        out_shape=jax.ShapeDtypeStruct((M_pad, N), x.dtype),
        grid_spec=pltpu.PrefetchScalarGridSpec(
            num_scalar_prefetch=0,
            grid=(M_pad // TM, N // TN, K // TK),
            in_specs=in_specs,
            out_specs=pl.BlockSpec((TM, TN), lambda i, j, k: (i, j)),
            scratch_shapes=[pltpu.VMEM((TM, TN), jnp.float32)],
        ),
        compiler_params=pltpu.CompilerParams(
            dimension_semantics=("parallel", "parallel", "arbitrary"),
            vmem_limit_bytes=_VMEM_LIMIT,
        ),
    )(*args)
    return out[:M] if M_pad != M else out


# --------------------------------------------------------------------------
# Kernel 2: 3x3 conv (padding=1), H-tiled, 9 accumulated matmuls in-kernel.
# Only 3 width-shifted copies per grid step (reused for all ki); scratch f32
# accumulator; optional fused residual add at writeback.
# --------------------------------------------------------------------------
def _conv3x3_body(x_ref, w_ref, b_ref, o_ref, acc_ref, res_ref, *, Hb, W):
    # x_ref: [H+2, W+2, Cin] (resident padded image), w_ref: [9, Cin, Cout]
    # b_ref: [1, Cout], o_ref: [Hb, W, Cout], acc_ref: [Hb*W, Cout] f32
    h = pl.program_id(1)
    row0 = pl.multiple_of(h * Hb, Hb)
    xt = x_ref[pl.ds(row0, Hb + 2), :, :]            # [Hb+2, W+2, Cin]
    Cin = xt.shape[-1]
    Cout = o_ref.shape[-1]

    first = True
    for kj in range(3):
        xs = xt[:, kj:kj + W, :]                     # one width-shift per kj (3 total)
        for ki in range(3):
            lhs = xs[ki:ki + Hb].reshape(Hb * W, Cin)   # leading-dim slice, free reshape
            contrib = jnp.dot(lhs, w_ref[ki * 3 + kj],
                              preferred_element_type=jnp.float32)
            if first:
                acc_ref[...] = contrib
                first = False
            else:
                acc_ref[...] += contrib

    y = acc_ref[...] + b_ref[...].astype(jnp.float32)
    if res_ref is not None:
        y = y + res_ref[...].reshape(Hb * W, Cout).astype(jnp.float32)
    o_ref[...] = y.reshape(Hb, W, Cout).astype(o_ref.dtype)


def _conv3x3_kernel(x_ref, w_ref, b_ref, o_ref, acc_ref, *, Hb, W):
    _conv3x3_body(x_ref, w_ref, b_ref, o_ref, acc_ref, None, Hb=Hb, W=W)


def _conv3x3_res_kernel(x_ref, w_ref, b_ref, r_ref, o_ref, acc_ref, *, Hb, W):
    _conv3x3_body(x_ref, w_ref, b_ref, o_ref, acc_ref, r_ref, Hb=Hb, W=W)


def conv3x3(x, w, b, residual=None):
    """3x3 conv, padding=1. x: [N,H,W,Cin], w: [3,3,Cin,Cout], b: [Cout].
    If `residual` ([N,H,W,Cout]) is given it is added in the kernel epilogue."""
    N, H, W, Cin = x.shape
    Cout = w.shape[-1]
    xp = jnp.pad(x, ((0, 0), (1, 1), (1, 1), (0, 0)))   # zero halo (only pad copy)
    w9 = w.reshape(9, Cin, Cout)
    Hb = _pick_row_tile(H)

    in_specs = [
        pl.BlockSpec((None, H + 2, W + 2, Cin), lambda n, h: (n, 0, 0, 0)),  # resident
        pl.BlockSpec((9, Cin, Cout), lambda n, h: (0, 0, 0)),
        pl.BlockSpec((1, Cout), lambda n, h: (0, 0)),
    ]
    args = [xp, w9, b.reshape(1, Cout)]
    if residual is not None:
        in_specs.append(pl.BlockSpec((None, Hb, W, Cout), lambda n, h: (n, h, 0, 0)))
        args.append(residual)
        kern = functools.partial(_conv3x3_res_kernel, Hb=Hb, W=W)
    else:
        kern = functools.partial(_conv3x3_kernel, Hb=Hb, W=W)

    # TODO(synk): for very large images on v7x, replace the resident full padded
    # image with a manual haloed-row DMA (memory_space=pl.ANY) so VMEM stays bounded.
    return pl.pallas_call(
        kern,
        out_shape=jax.ShapeDtypeStruct((N, H, W, Cout), x.dtype),
        grid_spec=pltpu.PrefetchScalarGridSpec(
            num_scalar_prefetch=0,
            grid=(N, H // Hb),
            in_specs=in_specs,
            out_specs=pl.BlockSpec((None, Hb, W, Cout), lambda n, h: (n, h, 0, 0)),
            scratch_shapes=[pltpu.VMEM((Hb * W, Cout), jnp.float32)],
        ),
        compiler_params=pltpu.CompilerParams(
            dimension_semantics=("parallel", "arbitrary"),
            vmem_limit_bytes=_VMEM_LIMIT,
        ),
    )(*args)


# --------------------------------------------------------------------------
# Kernel 3a/3b: GroupNorm as two passes (reduce, apply) with an H grid axis.
# Group statistics combination is tiny [N,C] math done in JAX glue.
# --------------------------------------------------------------------------
def _gn_reduce_kernel(x_ref, s1_ref, s2_ref):
    h = pl.program_id(1)

    @pl.when(h == 0)
    def _():
        s1_ref[...] = jnp.zeros_like(s1_ref)
        s2_ref[...] = jnp.zeros_like(s2_ref)

    x = x_ref[...].astype(jnp.float32)                         # [Hb, W, C]
    C = x.shape[-1]
    s1_ref[...] += jnp.sum(x, axis=(0, 1), keepdims=True).reshape(1, C)
    s2_ref[...] += jnp.sum(x * x, axis=(0, 1), keepdims=True).reshape(1, C)


def _gn_apply_kernel(x_ref, a_ref, b_ref, o_ref, *, apply_silu):
    y = x_ref[...].astype(jnp.float32) * a_ref[...] + b_ref[...]
    if apply_silu:
        y = y * jax.nn.sigmoid(y)
    o_ref[...] = y.astype(o_ref.dtype)


def _gn_scale_shift(s1, s2, gamma, beta, tbias, num_groups, hw, eps):
    """Tiny [N,C]/[N,G] math: fold (optional tbias), group stats, gamma/beta into
    per-(n,c) scale `a` and shift `b` so the apply pass is y = x*a + b."""
    Nb = s1.shape[0]
    s1 = s1.reshape(Nb, -1)
    s2 = s2.reshape(Nb, -1)
    C = s1.shape[1]
    cg = C // num_groups
    if tbias is not None:
        tb = tbias.astype(jnp.float32)
        s2 = s2 + 2.0 * tb * s1 + float(hw) * tb * tb
        s1 = s1 + float(hw) * tb
    g1 = s1.reshape(Nb, num_groups, cg).sum(-1)
    g2 = s2.reshape(Nb, num_groups, cg).sum(-1)
    cnt = float(hw * cg)
    mean = g1 / cnt
    var = g2 / cnt - mean * mean     # one-pass variance (f32) — see tolerance note
    inv = lax.rsqrt(var + eps)
    mean_c = jnp.repeat(mean, cg, axis=1)
    inv_c = jnp.repeat(inv, cg, axis=1)
    a = inv_c * gamma[None, :].astype(jnp.float32)
    tb_c = 0.0 if tbias is None else tbias.astype(jnp.float32)
    shift = (tb_c - mean_c) * a + beta[None, :].astype(jnp.float32)
    return a, shift


def group_norm_act(x, gamma, beta, num_groups, tbias=None, apply_silu=True, eps=1e-5):
    """x: [N,H,W,C]; tbias: optional [N,C] added before normalization (exact fold)."""
    N, H, W, C = x.shape
    Hb = _pick_row_tile(H)
    nH = H // Hb

    s1, s2 = pl.pallas_call(
        _gn_reduce_kernel,
        out_shape=(jax.ShapeDtypeStruct((N, 1, C), jnp.float32),
                   jax.ShapeDtypeStruct((N, 1, C), jnp.float32)),
        grid_spec=pltpu.PrefetchScalarGridSpec(
            num_scalar_prefetch=0,
            grid=(N, nH),
            in_specs=[pl.BlockSpec((None, Hb, W, C), lambda n, h: (n, h, 0, 0))],
            out_specs=(pl.BlockSpec((None, 1, C), lambda n, h: (n, 0, 0)),
                       pl.BlockSpec((None, 1, C), lambda n, h: (n, 0, 0))),
        ),
        compiler_params=pltpu.CompilerParams(
            dimension_semantics=("parallel", "arbitrary"),
            vmem_limit_bytes=_VMEM_LIMIT,
        ),
    )(x)

    a, shift = _gn_scale_shift(s1, s2, gamma, beta, tbias, num_groups, H * W, eps)

    return pl.pallas_call(
        functools.partial(_gn_apply_kernel, apply_silu=apply_silu),
        out_shape=jax.ShapeDtypeStruct(x.shape, x.dtype),
        grid_spec=pltpu.PrefetchScalarGridSpec(
            num_scalar_prefetch=0,
            grid=(N, nH),
            in_specs=[pl.BlockSpec((None, Hb, W, C), lambda n, h: (n, h, 0, 0)),
                      pl.BlockSpec((1, C), lambda n, h: (n, 0)),
                      pl.BlockSpec((1, C), lambda n, h: (n, 0))],
            out_specs=pl.BlockSpec((None, Hb, W, C), lambda n, h: (n, h, 0, 0)),
        ),
        compiler_params=pltpu.CompilerParams(
            dimension_semantics=("parallel", "parallel"),
            vmem_limit_bytes=_VMEM_LIMIT,
        ),
    )(x, a, shift)


# --------------------------------------------------------------------------
# Kernel 4: spatial self-attention — one lane-dense [S, 3C] block per batch
# element, head loop inside the kernel, per-head results stored directly
# into o_ref column slices (no concat).
# --------------------------------------------------------------------------
def _attn_kernel(qkv_ref, o_ref, *, heads, scale):
    qkv = qkv_ref[...]                           # [S, 3C] native dtype (no upcast)
    C = o_ref.shape[-1]
    Dh = C // heads
    for hd in range(heads):
        q = qkv[:, hd * Dh:(hd + 1) * Dh]
        k = qkv[:, C + hd * Dh:C + (hd + 1) * Dh]
        v = qkv[:, 2 * C + hd * Dh:2 * C + (hd + 1) * Dh]
        # contract over Dh; TODO(synk): check MLIR for an inserted k transpose and
        # feed k pre-transposed if the XLU becomes the bottleneck at large Dh.
        s = lax.dot_general(q, k, (((1,), (1,)), ((), ())),
                            preferred_element_type=jnp.float32) * scale      # [S, S]
        m = jnp.max(s, axis=-1, keepdims=True)
        p = jnp.exp(s - m)
        l = jnp.sum(p, axis=-1, keepdims=True)
        o = jnp.dot(p.astype(v.dtype), v, preferred_element_type=jnp.float32)
        o_ref[:, hd * Dh:(hd + 1) * Dh] = (
            o * pl.reciprocal(l, approx=True)).astype(o_ref.dtype)


def spatial_attention(qkv, heads, C):
    """qkv: [N, S, 3C] -> [N, S, C]."""
    N, S, _ = qkv.shape
    Dh = C // heads
    scale = 1.0 / (Dh ** 0.5)
    # TODO(synk): for S >= ~4k, add a KV grid axis with online softmax instead of
    # materializing the full [S,S] score matrix.
    return pl.pallas_call(
        functools.partial(_attn_kernel, heads=heads, scale=scale),
        out_shape=jax.ShapeDtypeStruct((N, S, C), qkv.dtype),
        grid_spec=pltpu.PrefetchScalarGridSpec(
            num_scalar_prefetch=0,
            grid=(N,),
            in_specs=[pl.BlockSpec((None, S, 3 * C), lambda n: (n, 0, 0))],
            out_specs=pl.BlockSpec((None, S, C), lambda n: (n, 0, 0)),
        ),
        compiler_params=pltpu.CompilerParams(
            dimension_semantics=("parallel",),
            vmem_limit_bytes=_VMEM_LIMIT,
        ),
    )(qkv)


# --------------------------------------------------------------------------
# Kernel 5: ConvTranspose2d(k=2, s=2) with the pixel-shuffle folded into the
# kernel: output is written as [N, 2H, W, 2*Cout] so the final JAX reshape to
# [N, 2H, 2W, Cout] is a free contiguous reshape (no HBM transpose pass).
# --------------------------------------------------------------------------
def _convt2x2_kernel(x_ref, w_ref, b_ref, o_ref, *, Hb, W):
    # x_ref: [Hb, W, Cin]; w_ref: [2, Cin, 2*Cout] (axis0 = kH offset, columns=(kW, c))
    # b_ref: [1, 2*Cout]; o_ref: [2*Hb, W, 2*Cout]
    Cin = x_ref.shape[-1]
    C2 = o_ref.shape[-1]
    x2d = x_ref[...].reshape(Hb * W, Cin)
    bias = b_ref[...].astype(jnp.float32)
    y0 = jnp.dot(x2d, w_ref[0], preferred_element_type=jnp.float32) + bias
    y1 = jnp.dot(x2d, w_ref[1], preferred_element_type=jnp.float32) + bias
    # interleave the two kH offsets along the (untiled) row axis
    y = jnp.concatenate([y0.reshape(Hb, 1, W, C2), y1.reshape(Hb, 1, W, C2)], axis=1)
    o_ref[...] = y.reshape(2 * Hb, W, C2).astype(o_ref.dtype)


def conv_transpose_2x2(x, w, b):
    """ConvTranspose2d(k=2, s=2). x: [N,H,W,Cin], w: [Cin,2,2,Cout], b: [Cout].
    NOTE: PyTorch stores ConvTranspose2d weights as (Cin, Cout, kH, kW); a permute
    is required when importing real PyTorch weights."""
    N, H, W, Cin = x.shape
    Cout = w.shape[-1]
    w_r = jnp.transpose(w, (1, 0, 2, 3)).reshape(2, Cin, 2 * Cout)  # [kH, Cin, (kW,c)]
    b2 = jnp.tile(b, 2).reshape(1, 2 * Cout)
    Hb = _pick_row_tile(H)

    y = pl.pallas_call(
        functools.partial(_convt2x2_kernel, Hb=Hb, W=W),
        out_shape=jax.ShapeDtypeStruct((N, 2 * H, W, 2 * Cout), x.dtype),
        grid_spec=pltpu.PrefetchScalarGridSpec(
            num_scalar_prefetch=0,
            grid=(N, H // Hb),
            in_specs=[pl.BlockSpec((None, Hb, W, Cin), lambda n, h: (n, h, 0, 0)),
                      pl.BlockSpec((2, Cin, 2 * Cout), lambda n, h: (0, 0, 0)),
                      pl.BlockSpec((1, 2 * Cout), lambda n, h: (0, 0))],
            out_specs=pl.BlockSpec((None, 2 * Hb, W, 2 * Cout), lambda n, h: (n, h, 0, 0)),
        ),
        compiler_params=pltpu.CompilerParams(
            dimension_semantics=("parallel", "parallel"),
            vmem_limit_bytes=_VMEM_LIMIT,
        ),
    )(x, w_r, b2)
    # [N, 2H, W, 2*Cout] -> [N, 2H, 2W, Cout]: contiguous reshape, no transpose pass.
    return y.reshape(N, 2 * H, 2 * W, Cout)


def conv1x1(x, w, b, residual=None):
    N, H, W, Cin = x.shape
    Cout = w.shape[-1]
    r = None if residual is None else residual.reshape(N * H * W, Cout)
    y = matmul_bias(x.reshape(N * H * W, Cin), w, b, residual=r)
    return y.reshape(N, H, W, Cout)


# --------------------------------------------------------------------------
# ResBlock / AttnBlock / ResLevel / Up forward
# --------------------------------------------------------------------------
NUM_GROUPS = 4


def res_block(x, t_emb, p):
    h = group_norm_act(x, p["gn1_g"], p["gn1_b"], NUM_GROUPS, apply_silu=True)
    h = conv3x3(h, p["conv1_w"], p["conv1_b"])
    t = jax.nn.silu(t_emb)                                     # tiny glue
    tb = matmul_bias(t, p["temb_w"], p["temb_b"])              # [N, Cout] time projection
    h = group_norm_act(h, p["gn2_g"], p["gn2_b"], NUM_GROUPS, tbias=tb, apply_silu=True)
    # TODO(synk): dropout is identity here (eval-mode semantics); training RNG dropout not implemented.
    skip = conv1x1(x, p["skip_w"], p["skip_b"]) if "skip_w" in p else x
    return conv3x3(h, p["conv2_w"], p["conv2_b"], residual=skip)   # fused residual add


def attn_block(x, p, num_heads):
    N, H, W, C = x.shape
    h = group_norm_act(x, p["norm_g"], p["norm_b"], NUM_GROUPS, apply_silu=False)
    qkv = conv1x1(h, p["qkv_w"], p["qkv_b"])                   # [N,H,W,3C]
    qkv = qkv.reshape(N, H * W, 3 * C)                         # contiguous (free)
    o = spatial_attention(qkv, num_heads, C)                   # [N,S,C]
    o = o.reshape(N, H, W, C)
    return conv1x1(o, p["proj_w"], p["proj_b"], residual=x)    # fused residual add


def up_forward(x_nchw, time_embed, down_outputs_nchw, params):
    """Mirrors Up.forward: ConvTranspose2d -> concat(popped skip) -> ResLevel, per level."""
    out = jnp.transpose(x_nchw, (0, 2, 3, 1))                           # NCHW -> NHWC
    downs = [jnp.transpose(d, (0, 2, 3, 1)) for d in down_outputs_nchw]
    for level in params:
        out = conv_transpose_2x2(out, level["convt_w"], level["convt_b"])
        down = downs.pop()
        out = jnp.concatenate([out, down], axis=-1)                     # cat along channels
        for rb in level["res_blocks"]:
            out = res_block(out, time_embed, rb)
        if level["use_attn"]:
            out = attn_block(out, level["attn"], level["num_heads"])
    return jnp.transpose(out, (0, 3, 1, 2))                             # NHWC -> NCHW


# --------------------------------------------------------------------------
# Deterministic parameter construction (mirrors Up.build_block shapes)
# --------------------------------------------------------------------------
class KeyGen:
    def __init__(self, key):
        self.key = key

    def __call__(self):
        self.key, k = jax.random.split(self.key)
        return k


def _normal(kg, shape, scale=0.1):
    return scale * jax.random.normal(kg(), shape, jnp.float32)


def init_params(kg, channel_arr, block_arr, attn_arr, embed_dim):
    params = []
    num_levels = len(channel_arr)
    c_in = channel_arr[-1]
    for i in reversed(range(num_levels - 1)):
        c_out = channel_arr[i]
        num_blocks = block_arr[i]
        use_attn, num_heads = attn_arr[i]
        level = {
            "convt_w": _normal(kg, (c_in, 2, 2, c_out)),
            "convt_b": _normal(kg, (c_out,)),
            "use_attn": use_attn,
            "num_heads": num_heads,
        }
        res_blocks = []
        rb_in = 2 * c_out
        for _ in range(num_blocks):
            rb = {
                "gn1_g": jnp.ones((rb_in,), jnp.float32),
                "gn1_b": jnp.zeros((rb_in,), jnp.float32),
                "conv1_w": _normal(kg, (3, 3, rb_in, c_out)),
                "conv1_b": _normal(kg, (c_out,)),
                "temb_w": _normal(kg, (embed_dim, c_out)),
                "temb_b": _normal(kg, (c_out,)),
                "gn2_g": jnp.ones((c_out,), jnp.float32),
                "gn2_b": jnp.zeros((c_out,), jnp.float32),
                "conv2_w": _normal(kg, (3, 3, c_out, c_out)),
                "conv2_b": _normal(kg, (c_out,)),
            }
            if rb_in != c_out:
                rb["skip_w"] = _normal(kg, (rb_in, c_out))
                rb["skip_b"] = _normal(kg, (c_out,))
            res_blocks.append(rb)
            rb_in = c_out
        level["res_blocks"] = res_blocks
        if use_attn:
            level["attn"] = {
                "norm_g": jnp.ones((c_out,), jnp.float32),
                "norm_b": jnp.zeros((c_out,), jnp.float32),
                "qkv_w": _normal(kg, (c_out, 3 * c_out)),
                "qkv_b": _normal(kg, (3 * c_out,)),
                "proj_w": _normal(kg, (c_out, c_out)),
                "proj_b": _normal(kg, (c_out,)),
            }
        params.append(level)
        c_in = c_out
    return params


# --------------------------------------------------------------------------
if __name__ == "__main__":
    channel_arr = [4, 8, 16]
    block_arr = [1, 1]
    attn_arr = [(False, 1), (True, 2)]
    embed_dim = 32
    dropout = 0.1  # eval-mode: unused

    kg = KeyGen(jax.random.PRNGKey(0))
    params = init_params(kg, channel_arr, block_arr, attn_arr, embed_dim)

    N = 2
    # NCHW inputs, mirroring the PyTorch interface.
    x = jax.random.normal(kg(), (N, channel_arr[-1], 8, 8), jnp.float32)
    time_embed = jax.random.normal(kg(), (N, embed_dim), jnp.float32)
    down_outputs = [
        jax.random.normal(kg(), (N, channel_arr[0], 32, 32), jnp.float32),
        jax.random.normal(kg(), (N, channel_arr[1], 16, 16), jnp.float32),
    ]

    out = up_forward(x, time_embed, down_outputs, params)
    out = jax.block_until_ready(out)

    assert out.shape == (N, channel_arr[0], 32, 32), out.shape
    assert bool(jnp.all(jnp.isfinite(out)))
    print("KERNEL_OK")
</pallas_src>

<mosaic_0001>
module attributes {stable_mosaic.version = 11 : i64} {
  func.func @_convt2x2_kernel(%arg0: i32, %arg1: i32, %arg2: memref<1x8x8x16xf32, #tpu.memory_space<vmem>>, %arg3: memref<2x16x16xf32, #tpu.memory_space<vmem>>, %arg4: memref<1x16xf32, #tpu.memory_space<vmem>>, %arg5: memref<1x16x8x16xf32, #tpu.memory_space<vmem>>) attributes {dimension_semantics = [#tpu.dimension_semantics<parallel>, #tpu.dimension_semantics<parallel>], iteration_bounds = array<i64: 2, 1>, scalar_prefetch = 0 : i64, scratch_operands = 0 : i64, tpu.core_type = #tpu.core_type<tc>, window_params = [{transform_indices = @transform_0, window_bounds = array<i64: 1, 8, 8, 16>}, {pipeline_mode = #tpu.pipeline_mode<synchronous>, transform_indices = @transform_1, window_bounds = array<i64: 2, 16, 16>}, {pipeline_mode = #tpu.pipeline_mode<synchronous>, transform_indices = @transform_2, window_bounds = array<i64: 1, 16>}, {transform_indices = @transform_3, window_bounds = array<i64: 1, 16, 8, 16>}]} {
    %c0 = arith.constant 0 : index
    %c0_0 = arith.constant 0 : index
    %c0_1 = arith.constant 0 : index
    %c0_2 = arith.constant 0 : index
    %0 = vector.load %arg2[%c0, %c0_0, %c0_1, %c0_2] : memref<1x8x8x16xf32, #tpu.memory_space<vmem>>, vector<1x8x8x16xf32>
    %1 = vector.shape_cast %0 : vector<1x8x8x16xf32> to vector<8x8x16xf32>
    %2 = vector.shape_cast %1 : vector<8x8x16xf32> to vector<64x16xf32>
    %c0_3 = arith.constant 0 : index
    %c0_4 = arith.constant 0 : index
    %3 = vector.load %arg4[%c0_3, %c0_4] : memref<1x16xf32, #tpu.memory_space<vmem>>, vector<1x16xf32>
    %c0_5 = arith.constant 0 : index
    %c0_6 = arith.constant 0 : index
    %c0_7 = arith.constant 0 : index
    %4 = vector.load %arg3[%c0_5, %c0_6, %c0_7] : memref<2x16x16xf32, #tpu.memory_space<vmem>>, vector<1x16x16xf32>
    %5 = vector.shape_cast %4 : vector<1x16x16xf32> to vector<16x16xf32>
    %cst = arith.constant dense<0.000000e+00> : vector<64x16xf32>
    %6 = tpu.matmul %2, %5, %cst {dimension_numbers = #tpu.dot_dimension_numbers<[1], [0], [0], [1], [0, 0, 1, 1], [], []>} : vector<64x16xf32>, vector<16x16xf32>, vector<64x16xf32> -> vector<64x16xf32>
    %7 = vector.broadcast %3 : vector<1x16xf32> to vector<64x16xf32>
    %8 = arith.addf %6, %7 : vector<64x16xf32>
    %c1 = arith.constant 1 : index
    %c0_8 = arith.constant 0 : index
    %c0_9 = arith.constant 0 : index
    %9 = vector.load %arg3[%c1, %c0_8, %c0_9] : memref<2x16x16xf32, #tpu.memory_space<vmem>>, vector<1x16x16xf32>
    %10 = vector.shape_cast %9 : vector<1x16x16xf32> to vector<16x16xf32>
    %cst_10 = arith.constant dense<0.000000e+00> : vector<64x16xf32>
    %11 = tpu.matmul %2, %10, %cst_10 {dimension_numbers = #tpu.dot_dimension_numbers<[1], [0], [0], [1], [0, 0, 1, 1], [], []>} : vector<64x16xf32>, vector<16x16xf32>, vector<64x16xf32> -> vector<64x16xf32>
    %12 = vector.broadcast %3 : vector<1x16xf32> to vector<64x16xf32>
    %13 = arith.addf %11, %12 : vector<64x16xf32>
    %14 = vector.shape_cast %8 : vector<64x16xf32> to vector<8x1x8x16xf32>
    %15 = vector.shape_cast %13 : vector<64x16xf32> to vector<8x1x8x16xf32>
    %16 = tpu.concatenate %14, %15 in 1 : vector<8x1x8x16xf32>, vector<8x1x8x16xf32> -> vector<8x2x8x16xf32>
    %17 = vector.shape_cast %16 : vector<8x2x8x16xf32> to vector<16x8x16xf32>
    %c0_11 = arith.constant 0 : index
    %c0_12 = arith.constant 0 : index
    %c0_13 = arith.constant 0 : index
    %c0_14 = arith.constant 0 : index
    %18 = vector.load %arg5[%c0_11, %c0_12, %c0_13, %c0_14] : memref<1x16x8x16xf32, #tpu.memory_space<vmem>>, vector<1x16x8x16xf32>
    %19 = vector.shape_cast %18 : vector<1x16x8x16xf32> to vector<16x8x16xf32>
    %20 = vector.shape_cast %17 : vector<16x8x16xf32> to vector<1x16x8x16xf32>
    tpu.vector_store %arg5[%c0_11, %c0_12, %c0_13, %c0_14], %20 {strides = array<i32>} : memref<1x16x8x16xf32, #tpu.memory_space<vmem>>, vector<1x16x8x16xf32>,
    return
  }
  func.func @transform_0(%arg0: i32, %arg1: i32) -> (i32, i32, i32, i32) {
    %c0_i32 = arith.constant 0 : i32
    %c0_i32_0 = arith.constant 0 : i32
    %c0_i32_1 = arith.constant 0 : i32
    return %arg0, %arg1, %c0_i32, %c0_i32_0 : i32, i32, i32, i32
  }
  func.func @transform_1(%arg0: i32, %arg1: i32) -> (i32, i32, i32) {
    %c0_i32 = arith.constant 0 : i32
    %c0_i32_0 = arith.constant 0 : i32
    %c0_i32_1 = arith.constant 0 : i32
    %c0_i32_2 = arith.constant 0 : i32
    return %c0_i32, %c0_i32_0, %c0_i32_1 : i32, i32, i32
  }
  func.func @transform_2(%arg0: i32, %arg1: i32) -> (i32, i32) {
    %c0_i32 = arith.constant 0 : i32
    %c0_i32_0 = arith.constant 0 : i32
    %c0_i32_1 = arith.constant 0 : i32
    return %c0_i32, %c0_i32_0 : i32, i32
  }
  func.func @transform_3(%arg0: i32, %arg1: i32) -> (i32, i32, i32, i32) {
    %c0_i32 = arith.constant 0 : i32
    %c0_i32_0 = arith.constant 0 : i32
    %c0_i32_1 = arith.constant 0 : i32
    return %arg0, %arg1, %c0_i32, %c0_i32_0 : i32, i32, i32, i32
  }
}

</mosaic_0001>

<bundles_post_ra>
// kernel: tpu_custom_call.1
= control target key start
LH: loop header
LB: loop body
LE: loop exit
PB: predicated region body
PF: predicated region fallthrough
CT: control target
= control target key end

     0   :  { %8 = vsyncpa [#allocation3], 0  ;;  %s1244_s0 = inlined_call_operand.hbm [shape: f32[2,8,8,16], index: 0, kind: input, shape index: {}]   ;;  %s1245_s1 = inlined_call_operand.hbm [shape: f32[2,16,16], index: 1, kind: input, shape index: {}]   ;;  %s1246_s2 = inlined_call_operand.vmem [shape: f32[1,16], index: 2, kind: input, shape index: {}]   ;;  %s1247_s3 = inlined_call_operand.hbm [shape: f32[2,16,8,16], index: 3, kind: output, shape index: {}]  }
   0x1   :  { %10 = vsyncpa [#allocation3 + $0x1], 0 }
   0x2   :  { %11 = vsyncpa [#allocation6], 0 }
   0x3   :  { %12 = vsyncpa [#allocation4], 0 }
   0x4   :  { %14 = vsyncpa [#allocation4 + $0x1], 0  ;;  %s954_s12 = smov 0   ;;  %s956_s13 = smov 0  }
   0x5   :  { %s958_s14 = smov 0   ;;  %s960_s15 = smov 0  }
   0x6   :  { %s962_s16 = smov 0   ;;  %s964_s17 = smov 0  }
   0x7 LB: > { %s608_s18 = sadd.s32 4294967295, %s925_s17   ;;  %s609_s19 = sadd.s32 4294967294, %s925_s17   ;;  %s925_s17 = sphi %s964_s17, %s20_s17   ;;  %s921_s16 = sphi %s962_s16, %s1271_s16   ;;  %s917_s15 = sphi %s960_s15, %s1270_s15   ;;  %s913_s14 = sphi %s958_s14, %s1269_s14   ;;  %s909_s13 = sphi %s956_s13, %s1268_s13   ;;  %s905_s12 = sphi %s954_s12, %s1267_s12  }
   0x8   : > { %p54_p0 = scmp.ne.s32.totalorder %s909_s13, %s905_s12  ;;  %p988_p1 = scmp.eq.s32.totalorder %s608_s18, 0 }
   0x9   : > { %p992_p2 = scmp.eq.s32.totalorder %s608_s18, 1  ;;  %p128_p3 = scmp.eq.s32.totalorder %s609_s19, 1 }
   0xa   : > { %s1252_s20 = scalar_select %p988_p1, 1, 0 }
   0xb   : > { %s1253_s21 = scalar_select %p992_p2, 1, 0 }
   0xc   : > { %p998_p4 = por %p988_p1, %p54_p0  ;;  %p610_p5 = scmp.ge.s32.totalorder %s925_s17, 1 }
   0xd   : > { %p1003_p6 = por %p128_p3, %p54_p0  ;;  %p135_p7 = scmp.lt.s32.totalorder %s925_s17, 3 }
   0xe   : > { %s1254_s22 = scalar_select %p998_p4, 1, 0 }
   0xf   : > { %s1255_s23 = scalar_select %p1003_p6, 1, 0 }
  0x10   : > { %p1008_p8 = pnand %p610_p5, %p135_p7  ;;  %s927_s25 = smov [#allocation5]  }
  0x11   : > { %s147_s26 = sshll.u32 %s927_s25, 4  ;;  %s32_s28 = sadd.s32 1, %s921_s16  ;;  %s148_s26 = int_to_ptr.vmem [resolvable:$true] %s147_s26 }
  0x12   : > { %s1256_s24 = scalar_select %p1008_p8, 1, 0 }
  0x13   : > { %p712_p9 = pneg %p1008_p8  ;;  %s781_s4 = scalar_lea.hbm %s1245_s1, 512 }
  0x14   : > { %p782_p12 = scmp.ne.s32.totalorder %s1245_s1, %s781_s4  ;;  %p788_p5 = scmp.lt.u32.totalorder %s781_s4, %s1245_s1 }
  0x15   : > { %p1017_p11 = pnand %p712_p9, %p988_p1 }
  0x17   : > { %p783_p13 = pneg %p1017_p11 }
  0x19   : > { %p784_p0 = pnand %p783_p13, %p782_p12 }
  0x1b   : > { %p785_p3 = pneg %p784_p0 }
  0x1d   : > { %p790_p7 = pnand %p788_p5, %p785_p3 }
  0x1f   : > { %793 = shalt.err (!%p790_p7)
}
  0x20   : > { %s794_s9 = scalar_lea.vmem %s148_s26, 512  ;;  %p802_p1 = scmp.lt.s32.totalorder %s148_s26, %s148_s26 }
  0x21   : > { %p795_p9 = scmp.ne.s32.totalorder %s148_s26, %s794_s9  ;;  %p803_p4 = scmp.lt.s32.totalorder %s794_s9, %s794_s9 }
  0x23   : > { %p797_p10 = pnand %p795_p9, %p783_p13  ;;  %p804_p8 = por %p803_p4, %p802_p1 }
  0x25   : > { %p798_p6 = pneg %p797_p10 }
  0x27   : > { %p805_p2 = pnand %p804_p8, %p798_p6 }
  0x29   : > { %808 = shalt.err (!%p805_p2)
}
  0x2a   : > { %s928_s10 = smov 128   ;;  %s929_s11 = smov 8  }
  0x2b   : > { %715 = dma.hbm_to_vmem [thread:$0]  (!%p1017_p11), %s1245_s1, 512, %s148_s26, [#allocation6], %s928_s10, %s928_s10, %s929_s11  }
  0x2c   : > { %p34_p1 = scmp.ge.s32.totalorder %s32_s28, 2  ;;  %s41_s25 = sadd.s32 1, %s913_s14 }
  0x2d   : > { %p48_p2 = scmp.ne.s32.totalorder %s913_s14, %s909_s13  ;;  %p49_p4 = scmp.eq.s32.totalorder %s925_s17, 0 }
  0x2e   : > { %s1273_s28 = smov (%p34_p1, %s32_s28), 0  ;;  %p1259_p8 = scmp.ne.s32.totalorder %s1253_s21, 0 }
  0x2f   : > { %p1047_p6 = por %p49_p4, %p48_p2  ;;  %s36_s30 = ssub.s32 %s921_s16, %s1273_s28 }
  0x30   : > { %p1053_p10 = por %p1259_p8, %p48_p2  ;;  %p725_p12 = scmp.lt.s32.totalorder %s925_s17, 2 }
  0x31   : > { %p39_p11 = scmp.eq.s32.totalorder %s36_s30, 0  ;;  %s164_s26 = sand.u32 1, %s913_s14  }
  0x32   : > { %s613_s4 = sshll.u32 %s164_s26, 6  ;;  %s642_s6 = sshll.u32 %s921_s16, 10 }
  0x33   : > { %s1062_s5 = scalar_select %p39_p11, %s913_s14, %s41_s25  }
  0x34   : > { %s1068_s9 = scalar_lea.hbm %s1244_s0, %s642_s6  ;;  %s168_s21 = scalar_lea.vmem [#allocation2], %s613_s4 }
  0x35   : > { %s177_s18 = sshll.u32 %s168_s21, 4  ;;  %p1074_p13 = pnand %p725_p12, %p1047_p6  ;;  %s1070_s18 = int_to_ptr.vmem [resolvable:$true] %s177_s18 }
  0x36   : > { %s1078_s25 = scalar_lea.sflag [#allocation3], %s164_s26  ;;  %s809_s30 = scalar_lea.hbm %s1068_s9, 1024 }
  0x37   : > { %p810_p0 = scmp.ne.s32.totalorder %s1068_s9, %s809_s30  ;;  %p811_p3 = pneg %p1074_p13 }
  0x38   : > { %s814_s29 = scalar_lea.hbm %s1244_s0, 2048  ;;  %p815_p9 = scmp.lt.u32.totalorder %s1068_s9, %s1244_s0 }
  0x39   : > { %p812_p5 = pnand %p811_p3, %p810_p0  ;;  %p816_p1 = scmp.lt.u32.totalorder %s814_s29, %s809_s30 }
  0x3a   : > { %p818_p4 = scmp.lt.u32.totalorder %s809_s30, %s1068_s9 }
  0x3b   : > { %p813_p7 = pneg %p812_p5  ;;  %p817_p2 = por %p816_p1, %p815_p9 }
  0x3d   : > { %p819_p6 = por %p818_p4, %p817_p2 }
  0x3f   : > { %p820_p8 = pnand %p819_p6, %p813_p7 }
  0x41   : > { %823 = shalt.err (!%p820_p8)
}
  0x42   : > { %s824_s26 = scalar_lea.vmem %s1070_s18, 1024  ;;  %s930_s21 = smov [#allocation2]  }
  0x43   : > { %p825_p12 = scmp.ne.s32.totalorder %s1070_s18, %s824_s26  ;;  %s829_s4 = sshll.u32 %s930_s21, 4  ;;  %s830_s4 = int_to_ptr.vmem [resolvable:$false] %s829_s4 }
  0x44   : > { %s831_s6 = scalar_lea.vmem %s830_s4, 2048  ;;  %p832_p5 = scmp.lt.s32.totalorder %s1070_s18, %s830_s4 }
  0x45   : > { %p827_p11 = pnand %p825_p12, %p811_p3  ;;  %p833_p9 = scmp.lt.s32.totalorder %s831_s6, %s824_s26 }
  0x47   : > { %p828_p0 = pneg %p827_p11  ;;  %p834_p1 = por %p833_p9, %p832_p5 }
  0x49   : > { %p835_p2 = pnand %p834_p1, %p828_p0 }
  0x4b   : > { %838 = shalt.err (!%p835_p2)
}
  0x4c   : > { %719 = dma.hbm_to_vmem [thread:$0]  (!%p1074_p13), %s1068_s9, 1024, %s1070_s18, %s1078_s25, %s928_s10, %s928_s10, %s929_s11  }
  0x4d   : > { %p1262_p3 = scmp.ne.s32.totalorder %s1256_s24, 0 }
  0x4e   : > { %s1112_s30 = sand.u32 (!%p1262_p3), 1, %s909_s13   ;;  %p1263_p7 = scmp.ne.s32.totalorder (!%p1262_p3), %s1254_s22, 0 }
  0x4f   : > { %189 = sbr.rel (%p1262_p3) target bundleno = 340 (0x154), region = 32  ;;  %s617_s29 = sshll.u32 (!%p1262_p3), %s1112_s30, 6 }
  0x50   : > { %s192_s7 = scalar_lea.sflag (!%p1262_p3), [#allocation3], %s1112_s30  ;;  %s1116_s8 = scalar_lea.vmem (!%p1262_p3), [#allocation2], %s617_s29 }
  0x56   : > { %892 = dma.done.wait (%p1263_p7), %s192_s7, 1024  }
  0x57   : > { %894 = vsyncadd (%p1263_p7), %s192_s7, 4294966272  ;;  %p1264_p13 = scmp.ne.s32.totalorder %s1252_s20, 0 }
  0x59   : > { %896 = dma.done.wait (%p1264_p13), [#allocation6], 512  }
  0x5a   : > { %898 = vsyncadd (%p1264_p13), [#allocation6], 4294966784  ;;  %vm241_vm0 = vcmask 130048   ;;  %v233_v0 = vld [vmem:[#allocation5] sm:$0xff]  ;;  %v234_v1 = vld [vmem:[#allocation5 + $0x8] sm:$0xff]  ;;  %s619_s20 = sshll.u32 %s1112_s30, 7 }
  0x5b   : > { %v372_v2 = vld [vmem:[#allocation5 + $0x10] sm:$0xff]  ;;  %v696_v3 = vpack.c.bf16 %v234_v1, %v233_v0  ;;  %v373_v4 = vld [vmem:[#allocation5 + $0x18] sm:$0xff]  ;;  %v224_v5 = vld [vmem:[%s1116_s8] sm:$0xff]  ;;  %s1154_s10 = scalar_lea.vmem [#allocation7], %s619_s20  ;;  %s643_s11 = sshll.u32 %s917_s15, 11 }
  0x5c   : > { %v700_v6 = vpack.c.bf16 %v373_v4, %v372_v2  ;;  %668 = vmatprep.mubr.msk.f32.mxu0 %vm241_vm0, %v224_v5  ;;  %684 = vmatprep.mubr.msk.f32.mxu1 %vm241_vm0, %v224_v5  ;;  %v225_v7 = vld [vmem:[%s1116_s8 + $0x8] sm:$0xff]  ;;  %v226_v8 = vld [vmem:[%s1116_s8 + $0x10] sm:$0xff]  ;;  %v227_v9 = vld [vmem:[%s1116_s8 + $0x18] sm:$0xff]  ;;  %s511_s9 = sshll.u32 %s1154_s10, 4  ;;  %s1185_s19 = scalar_lea.hbm %s1247_s3, %s643_s11  ;;  %s1187_s9 = int_to_ptr.vmem [resolvable:$true] %s511_s9 }
  0x5d   : > { %697 = vmatprep.subr.bf16.mxu0 %v696_v3  ;;  %v228_v10 = vld [vmem:[%s1116_s8 + $0x20] sm:$0xff]  ;;  %v229_v11 = vld [vmem:[%s1116_s8 + $0x28] sm:$0xff]  ;;  %v230_v12 = vld [vmem:[%s1116_s8 + $0x30] sm:$0xff]  ;;  %s496_s25 = scalar_lea.sflag [#allocation4], %s1112_s30  ;;  %s839_s26 = scalar_lea.vmem %s1187_s9, 2048 }
  0x5e   : > { %701 = vmatprep.subr.bf16.mxu1 %v700_v6  ;;  %699 = vmatpush3.bf16.msra.mxu0 %v696_v3  ;;  %v231_v13 = vld [vmem:[%s1116_s8 + $0x38] sm:$0xff]  ;;  %v620_v14 = vld [vmem:[%s1246_s2] ss:$0 sm:$0xff]  ;;  %p840_p4 = scmp.ne.s32.totalorder %s1187_s9, %s839_s26  ;;  %s931_s21 = smov [#allocation7]  }
  0x5f   : > { %703 = vmatpush3.bf16.msra.mxu1 %v700_v6  ;;  %s843_s4 = sshll.u32 %s931_s21, 4  ;;  %s844_s4 = int_to_ptr.vmem [resolvable:$false] %s843_s4 }
  0x60   : > { %p841_p6 = pnand %p840_p4, %p1053_p10  ;;  %s845_s6 = scalar_lea.vmem %s844_s4, 4096 }
  0x61   : > { %669 = vmatmul.mubr.msk.f32.vlgmr.msra.gmra.mrb[0].mxu0 %vm241_vm0, %v225_v7  ;;  %p846_p12 = scmp.lt.s32.totalorder %s1187_s9, %s844_s4  ;;  %p847_p11 = scmp.lt.s32.totalorder %s845_s6, %s839_s26 }
  0x62   : > { %685 = vmatmul.mubr.msk.f32.vlgmr.msra.gmra.mrb[0].mxu1 %vm241_vm0, %v225_v7  ;;  %671 = vmatprep.mubr.msk.f32.mxu0 %vm241_vm0, %v226_v8  ;;  %p842_p8 = pneg %p841_p6 }
  0x63   : > { %687 = vmatprep.mubr.msk.f32.mxu1 %vm241_vm0, %v226_v8  ;;  %p848_p0 = por %p847_p11, %p846_p12 }
  0x65   : > { %672 = vmatmul.mubr.msk.f32.gmra.mrb[2].mxu0 %vm241_vm0, %v227_v9  ;;  %p849_p5 = pnand %p848_p0, %p842_p8 }
  0x66   : > { %688 = vmatmul.mubr.msk.f32.gmra.mrb[2].mxu1 %vm241_vm0, %v227_v9  ;;  %674 = vmatprep.mubr.msk.f32.mxu0 %vm241_vm0, %v228_v10 }
  0x67   : > { %690 = vmatprep.mubr.msk.f32.mxu1 %vm241_vm0, %v228_v10 }
  0x69   : > { %675 = vmatmul.mubr.msk.f32.gmra.mrb[4].mxu0 %vm241_vm0, %v229_v11 }
  0x6a   : > { %691 = vmatmul.mubr.msk.f32.gmra.mrb[4].mxu1 %vm241_vm0, %v229_v11  ;;  %677 = vmatprep.mubr.msk.f32.mxu0 %vm241_vm0, %v230_v12 }
  0x6b   : > { %693 = vmatprep.mubr.msk.f32.mxu1 %vm241_vm0, %v230_v12 }
  0x6d   : > { %678 = vmatmul.mubr.msk.f32.gmra.mrb[6].mxu0 %vm241_vm0, %v231_v13 }
  0x6e   : > { %694 = vmatmul.mubr.msk.f32.gmra.mrb[6].mxu1 %vm241_vm0, %v231_v13 }
 0x134   : > { %v670_v15 = vpop.f32.mrb[0].mxu0 }
 0x135   : > { %v338_v16 = vadd.f32 %v670_v15, %v620_v14  ;;  %v686_v17 = vpop.f32.mrb[0].mxu1  ;;  %v332_v18 = vpop.f32.mrb[1].mxu0 }
 0x136   : > { %v446_v19 = vadd.f32 %v686_v17, %v620_v14  ;;  %v333_v20 = vadd.f32 %v620_v14, %v332_v18  ;;  %v440_v21 = vpop.f32.mrb[1].mxu1 }
 0x137   : > { %481 = vst.msk [vmem:[%s1154_s10 + $0x10] sm:$0xff] %vm241_vm0, %v338_v16  ;;  %v441_v22 = vadd.f32 %v620_v14, %v440_v21 }
 0x138   : > { %482 = vst.msk [vmem:[%s1154_s10 + $0x18] sm:$0xff] %vm241_vm0, %v446_v19  ;;  %479 = vst.msk [vmem:[%s1154_s10] sm:$0xff] %vm241_vm0, %v333_v20  ;;  %v673_v23 = vpop.f32.mrb[2].mxu0 }
 0x139   : > { %480 = vst.msk [vmem:[%s1154_s10 + $0x8] sm:$0xff] %vm241_vm0, %v441_v22  ;;  %v348_v24 = vadd.f32 %v673_v23, %v620_v14  ;;  %v689_v25 = vpop.f32.mrb[2].mxu1  ;;  %v342_v26 = vpop.f32.mrb[3].mxu0 }
 0x13a   : > { %v456_v27 = vadd.f32 %v689_v25, %v620_v14  ;;  %v343_v28 = vadd.f32 %v620_v14, %v342_v26  ;;  %v450_v29 = vpop.f32.mrb[3].mxu1 }
 0x13b   : > { %485 = vst.msk [vmem:[%s1154_s10 + $0x30] sm:$0xff] %vm241_vm0, %v348_v24  ;;  %v451_v30 = vadd.f32 %v620_v14, %v450_v29 }
 0x13c   : > { %486 = vst.msk [vmem:[%s1154_s10 + $0x38] sm:$0xff] %vm241_vm0, %v456_v27  ;;  %483 = vst.msk [vmem:[%s1154_s10 + $0x20] sm:$0xff] %vm241_vm0, %v343_v28  ;;  %v676_v31 = vpop.f32.mrb[4].mxu0 }
 0x13d   : > { %484 = vst.msk [vmem:[%s1154_s10 + $0x28] sm:$0xff] %vm241_vm0, %v451_v30  ;;  %v358_v32 = vadd.f32 %v676_v31, %v620_v14  ;;  %v692_v33 = vpop.f32.mrb[4].mxu1  ;;  %v352_v34 = vpop.f32.mrb[5].mxu0 }
 0x13e   : > { %v466_v35 = vadd.f32 %v692_v33, %v620_v14  ;;  %v353_v36 = vadd.f32 %v620_v14, %v352_v34  ;;  %v460_v37 = vpop.f32.mrb[5].mxu1 }
 0x13f   : > { %489 = vst.msk [vmem:[%s1154_s10 + $0x50] sm:$0xff] %vm241_vm0, %v358_v32  ;;  %v461_v38 = vadd.f32 %v620_v14, %v460_v37 }
 0x140   : > { %490 = vst.msk [vmem:[%s1154_s10 + $0x58] sm:$0xff] %vm241_vm0, %v466_v35  ;;  %487 = vst.msk [vmem:[%s1154_s10 + $0x40] sm:$0xff] %vm241_vm0, %v353_v36  ;;  %v679_v39 = vpop.f32.mrb[6].mxu0 }
 0x141   : > { %488 = vst.msk [vmem:[%s1154_s10 + $0x48] sm:$0xff] %vm241_vm0, %v461_v38  ;;  %v368_v40 = vadd.f32 %v679_v39, %v620_v14  ;;  %v695_v41 = vpop.f32.mrb[6].mxu1  ;;  %v362_v42 = vpop.f32.mrb[7].mxu0 }
 0x142   : > { %v476_v43 = vadd.f32 %v695_v41, %v620_v14  ;;  %v363_v44 = vadd.f32 %v620_v14, %v362_v42  ;;  %v470_v45 = vpop.f32.mrb[7].mxu1 }
 0x143   : > { %493 = vst.msk [vmem:[%s1154_s10 + $0x70] sm:$0xff] %vm241_vm0, %v368_v40  ;;  %v471_v46 = vadd.f32 %v620_v14, %v470_v45 }
 0x144   : > { %494 = vst.msk [vmem:[%s1154_s10 + $0x78] sm:$0xff] %vm241_vm0, %v476_v43  ;;  %491 = vst.msk [vmem:[%s1154_s10 + $0x60] sm:$0xff] %vm241_vm0, %v363_v44 }
 0x145   : > { %492 = vst.msk [vmem:[%s1154_s10 + $0x68] sm:$0xff] %vm241_vm0, %v471_v46 }
 0x146   : > { %852 = shalt.err (!%p849_p5)
}
 0x147   : > { %s853_s29 = scalar_lea.hbm %s1185_s19, 2048  ;;  %s857_s20 = scalar_lea.hbm %s1247_s3, 4096 }
 0x148   : > { %p854_p9 = scmp.ne.s32.totalorder %s1185_s19, %s853_s29  ;;  %p858_p3 = scmp.lt.u32.totalorder %s1185_s19, %s1247_s3 }
 0x149   : > { %p859_p7 = scmp.lt.u32.totalorder %s857_s20, %s853_s29  ;;  %p861_p4 = scmp.lt.u32.totalorder %s853_s29, %s1185_s19 }
 0x14a   : > { %p855_p1 = pnand %p854_p9, %p1053_p10 }
 0x14b   : > { %p860_p13 = por %p859_p7, %p858_p3 }
 0x14c   : > { %p856_p2 = pneg %p855_p1 }
 0x14d   : > { %p862_p6 = por %p861_p4, %p860_p13 }
 0x14f   : > { %p863_p8 = pnand %p862_p6, %p856_p2 }
 0x151   : > { %866 = shalt.err (!%p863_p8)
}
 0x152   : > { %s932_s10 = smov 128   ;;  %s933_s11 = smov 8  }
 0x153   : > { %710 = dma.vmem_to_hbm [thread:$0]  (%p1053_p10), %s1187_s9, 2048, %s1185_s19, %s496_s25, %s932_s10, %s932_s10, %s933_s11  }
 0x154 PF: > { %s526_s15 = sand.u32 1, %s905_s12   ;;  %p1265_p12 = scmp.ne.s32.totalorder %s1255_s23, 0 }
 0x155   : > { %p1266_p11 = scmp.ge.s32.totalorder %s925_s17, 2  ;;  %s527_s18 = scalar_lea.sflag [#allocation4], %s526_s15 }
 0x157   : > { %p721_p0 = pnand %p1266_p11, %p1265_p12 }
 0x159   : > { %900 = dma.done.wait (!%p721_p0), %s527_s18, 2048  }
 0x15a   : > { %902 = vsyncadd (!%p721_p0), %s527_s18, 4294965248  ;;  %s20_s17 = sadd.s32 1, %s925_s17   ;;  %s1267_s12 = smov %s909_s13 }
 0x15b   : > { %p17_p5 = scmp.ge.s32.totalorder %s20_s17, 4   ;;  %s1268_s13 = smov %s913_s14 }
 0x15c   : > { %s1269_s14 = smov %s1062_s5  ;;  %s1270_s15 = smov %s921_s16 }
 0x15d   : > { %s1271_s16 = smov %s1273_s28  ;;  %19 = sbr.rel (!%p17_p5) target bundleno = 7 (0x7), region = 82 }
 0x164   :  { %532 = vsyncpa [#allocation3], 1 }
 0x165   :  { %534 = vsyncpa [#allocation3 + $0x1], 1 }
 0x166   :  { %535 = vsyncpa [#allocation6], 1 }
 0x167   :  { %536 = vsyncpa [#allocation4], 1 }
 0x168   :  { %538 = vsyncpa [#allocation4 + $0x1], 1 }

</bundles_post_ra>
